<compile_context>
chip_gen: v5e
topology: v5e:2x2
jax: 0.10.0
libtpu: 0.0.40
codegen_flags: <defaults>
</compile_context>

<pallas_src>
import functools

import jax
import jax.numpy as jnp
from jax.experimental import pallas as pl
from jax.experimental.pallas import tpu as pltpu

_EPS = 1e-6
_MOMENTUM = 0.5
_LANE = 128
_SUBLANE = 8


def _vmem_capacity_bytes():
    try:
        return int(pltpu.get_tpu_info().vmem_capacity_bytes)
    except Exception:
        return 64 << 20  # conservative default (v7x per-TensorCore VMEM)


# ---------------------------------------------------------------------------
# Fused single-pass kernel: whole batch axis resident per feature tile.
# ---------------------------------------------------------------------------
def _bn_fused_kernel(x_ref, gamma_ref, beta_ref, mm_ref, mv_ref,
                     out_ref, new_mm_ref, new_mv_ref, *, inv_n):
    # Pass 1 over the block: mean (XLU reduction over the sublane axis).
    mean = jnp.sum(x_ref[...].astype(jnp.float32), axis=0, keepdims=True) * inv_n
    # Pass 2: centered variance.  Re-reading x from VMEM is free (mem-bound
    # kernel, plenty of load/VPU slack), avoids keeping an [N, TF] f32 copy
    # live and avoids E[x^2]-mean^2 cancellation.
    d = x_ref[...].astype(jnp.float32) - mean
    var = jnp.sum(d * d, axis=0, keepdims=True) * inv_n      # biased variance

    inv_std = jax.lax.rsqrt(var + _EPS)                       # EUP rsqrt
    scale = gamma_ref[...].astype(jnp.float32) * inv_std      # [1, TF]
    shift = beta_ref[...].astype(jnp.float32) - mean * scale  # [1, TF]

    # Hot [N, TF] path: one mul + one add per element.
    out_ref[...] = (x_ref[...].astype(jnp.float32) * scale + shift).astype(out_ref.dtype)

    # Fused EMA of the moving stats (momentum = 0.5, biased var as in MyBN).
    new_mm_ref[...] = _MOMENTUM * mm_ref[...].astype(jnp.float32) + (1.0 - _MOMENTUM) * mean
    new_mv_ref[...] = _MOMENTUM * mv_ref[...].astype(jnp.float32) + (1.0 - _MOMENTUM) * var


# ---------------------------------------------------------------------------
# Two-pass path for very large N: stats pass (resident [1, TF] accumulators
# over N-chunks) + apply pass.
# ---------------------------------------------------------------------------
def _bn_stats_kernel(x_ref, sum_ref, ssq_ref, *, n_rows, tn):
    ni = pl.program_id(1)

    @pl.when(ni == 0)
    def _():
        sum_ref[...] = jnp.zeros_like(sum_ref)
        ssq_ref[...] = jnp.zeros_like(ssq_ref)

    x = x_ref[...].astype(jnp.float32)                        # [TN, TF]
    row = ni * tn + jax.lax.broadcasted_iota(jnp.int32, x.shape, 0)
    x = jnp.where(row < n_rows, x, 0.0)                       # mask ragged batch rows
    sum_ref[...] += jnp.sum(x, axis=0, keepdims=True)
    ssq_ref[...] += jnp.sum(x * x, axis=0, keepdims=True)


def _bn_apply_kernel(x_ref, scale_ref, shift_ref, out_ref):
    out_ref[...] = (x_ref[...].astype(jnp.float32) * scale_ref[...]
                    + shift_ref[...]).astype(out_ref.dtype)


# ---------------------------------------------------------------------------
# Tile planning: target block *bytes*, generation-aware.
# ---------------------------------------------------------------------------
def _round_down(v, m):
    return (v // m) * m


def _plan(n_rows, f, in_isz, out_isz, cap):
    """Return ('fused', TF) or ('two_pass', TN, TF)."""
    budget = int(cap * 0.375)  # ~35-40% of VMEM for double-buffered blocks
    f_pad = pl.cdiv(f, _LANE) * _LANE
    # bytes per feature lane for the fused path: double-buffered x in/out
    # blocks + ~one f32 [N, TF] body temporary.
    per_lane = n_rows * (2 * in_isz + 2 * out_isz + 4)
    tf_max = _round_down(budget // per_lane, _LANE)
    if tf_max >= _LANE:
        if f <= _LANE:
            return ("fused", f)  # block == full feature dim, no ragged lanes
        tf = min(tf_max, f_pad)
        # Guarantee >= 2 grid steps so "parallel" can shard across v7x's 2 TCs.
        if pl.cdiv(f, tf) == 1 and f_pad >= 2 * _LANE:
            tf = pl.cdiv(f_pad // 2, _LANE) * _LANE
        return ("fused", tf)
    # Batch axis too large for one resident block -> two-pass path.
    tf = min(f_pad, 512) if f > _LANE else f
    per_row = tf * (2 * in_isz + 2 * out_isz + 4)
    tn = max(_round_down(budget // per_row, _SUBLANE), _SUBLANE)
    tn = min(tn, pl.cdiv(n_rows, _SUBLANE) * _SUBLANE)
    return ("two_pass", tn, tf)


@functools.partial(jax.jit, static_argnames=("training",))
def mybn_forward(x, gamma, beta, moving_mean, moving_var, training=True):
    """x: [N, F]; gamma/beta/moving_*: [F]. Returns (out, new_mm, new_mv)."""
    if not training:
        # Eval path: trivial elementwise op on moving stats, plain JAX.
        x_ = (x - moving_mean) * jax.lax.rsqrt(moving_var + _EPS)
        return gamma * x_ + beta, moving_mean, moving_var

    N, F = x.shape
    cap = _vmem_capacity_bytes()
    in_isz = x.dtype.itemsize
    out_isz = x.dtype.itemsize
    plan = _plan(N, F, in_isz, out_isz, cap)

    # Reshape-only (no HBM copy): parameter / stat rows as [1, F] f32.
    g2 = gamma.reshape(1, F).astype(jnp.float32)
    b2 = beta.reshape(1, F).astype(jnp.float32)
    mm2 = moving_mean.reshape(1, F).astype(jnp.float32)
    mv2 = moving_var.reshape(1, F).astype(jnp.float32)

    if plan[0] == "fused":
        tf = plan[1]
        grid = (pl.cdiv(F, tf),)
        blk = pl.BlockSpec((N, tf), lambda j: (0, j))
        row = pl.BlockSpec((1, tf), lambda j: (0, j))
        needed = (2 * N * tf * (in_isz + out_isz)   # double-buffered x in/out blocks
                  + 2 * N * tf * 4                  # headroom for f32 body temporaries
                  + 2 * 7 * tf * 4                  # parameter / stat rows
                  + (2 << 20))
        vmem_limit = int(min(max(needed, 16 << 20), int(cap * 0.9)))

        out, new_mm, new_mv = pl.pallas_call(
            functools.partial(_bn_fused_kernel, inv_n=float(1.0 / N)),
            grid=grid,
            in_specs=[blk, row, row, row, row],
            out_specs=[blk, row, row],
            out_shape=[
                jax.ShapeDtypeStruct((N, F), x.dtype),
                jax.ShapeDtypeStruct((1, F), jnp.float32),
                jax.ShapeDtypeStruct((1, F), jnp.float32),
            ],
            compiler_params=pltpu.CompilerParams(
                dimension_semantics=("parallel",),
                vmem_limit_bytes=vmem_limit,
            ),
        )(x, g2, b2, mm2, mv2)
        return out, new_mm[0], new_mv[0]

    # -------------------- two-pass path (very large N) --------------------
    _, tn, tf = plan
    f_grid = pl.cdiv(F, tf)
    n_grid = pl.cdiv(N, tn)
    needed = (2 * tn * tf * (in_isz + out_isz) + 2 * tn * tf * 4
              + 2 * 4 * tf * 4 + (2 << 20))
    vmem_limit = int(min(max(needed, 16 << 20), int(cap * 0.9)))

    xsum, xssq = pl.pallas_call(
        functools.partial(_bn_stats_kernel, n_rows=N, tn=tn),
        grid=(f_grid, n_grid),  # reduction (N) axis last
        in_specs=[pl.BlockSpec((tn, tf), lambda fi, ni: (ni, fi))],
        out_specs=[pl.BlockSpec((1, tf), lambda fi, ni: (0, fi)),
                   pl.BlockSpec((1, tf), lambda fi, ni: (0, fi))],
        out_shape=[jax.ShapeDtypeStruct((1, F), jnp.float32),
                   jax.ShapeDtypeStruct((1, F), jnp.float32)],
        compiler_params=pltpu.CompilerParams(
            dimension_semantics=("parallel", "arbitrary"),
            vmem_limit_bytes=vmem_limit,
        ),
    )(x)

    # O(F) parameter folding + EMA on tiny rows (negligible vs the [N,F] passes).
    mean = xsum * (1.0 / N)
    var = jnp.maximum(xssq * (1.0 / N) - mean * mean, 0.0)    # biased variance
    inv_std = jax.lax.rsqrt(var + _EPS)
    scale = g2 * inv_std
    shift = b2 - mean * scale
    new_mm = _MOMENTUM * mm2 + (1.0 - _MOMENTUM) * mean
    new_mv = _MOMENTUM * mv2 + (1.0 - _MOMENTUM) * var

    out = pl.pallas_call(
        _bn_apply_kernel,
        grid=(f_grid, n_grid),
        in_specs=[pl.BlockSpec((tn, tf), lambda fi, ni: (ni, fi)),
                  pl.BlockSpec((1, tf), lambda fi, ni: (0, fi)),
                  pl.BlockSpec((1, tf), lambda fi, ni: (0, fi))],
        out_specs=pl.BlockSpec((tn, tf), lambda fi, ni: (ni, fi)),
        out_shape=jax.ShapeDtypeStruct((N, F), x.dtype),
        compiler_params=pltpu.CompilerParams(
            dimension_semantics=("parallel", "parallel"),
            vmem_limit_bytes=vmem_limit,
        ),
    )(x, scale, shift)

    return out, new_mm[0], new_mv[0]


if __name__ == "__main__":
    key = jax.random.PRNGKey(0)
    N, F = 8, 32
    x = jax.random.normal(key, (N, F), dtype=jnp.float32)

    # Deterministic parameter init, matching MyBN.__init__
    gamma = jnp.ones((F,), dtype=jnp.float32)
    beta = jnp.zeros((F,), dtype=jnp.float32)
    moving_mean = jnp.zeros((F,), dtype=jnp.float32)
    moving_var = jnp.zeros((F,), dtype=jnp.float32)

    out, new_mm, new_mv = mybn_forward(x, gamma, beta, moving_mean, moving_var,
                                       training=True)
    jax.block_until_ready((out, new_mm, new_mv))

    # Reference check (plain JAX, same math as the PyTorch forward).
    xmean = jnp.mean(x, axis=0)
    xvar = jnp.mean((x - xmean) ** 2, axis=0)
    ref = gamma * ((x - xmean) / jnp.sqrt(xvar + _EPS)) + beta
    assert jnp.allclose(out, ref, atol=1e-5, rtol=1e-5)
    assert jnp.allclose(new_mm, 0.5 * xmean, atol=1e-6)
    assert jnp.allclose(new_mv, 0.5 * xvar, atol=1e-5)

    print("KERNEL_OK")
</pallas_src>

<mosaic_0001>
module attributes {stable_mosaic.version = 11 : i64} {
  func.func @_bn_fused_kernel(%arg0: i32, %arg1: memref<8x32xf32, #tpu.memory_space<vmem>>, %arg2: memref<1x32xf32, #tpu.memory_space<vmem>>, %arg3: memref<1x32xf32, #tpu.memory_space<vmem>>, %arg4: memref<1x32xf32, #tpu.memory_space<vmem>>, %arg5: memref<1x32xf32, #tpu.memory_space<vmem>>, %arg6: memref<8x32xf32, #tpu.memory_space<vmem>>, %arg7: memref<1x32xf32, #tpu.memory_space<vmem>>, %arg8: memref<1x32xf32, #tpu.memory_space<vmem>>) attributes {dimension_semantics = [#tpu.dimension_semantics<parallel>], iteration_bounds = array<i64: 1>, scalar_prefetch = 0 : i64, scratch_operands = 0 : i64, tpu.core_type = #tpu.core_type<tc>, window_params = [{transform_indices = @transform_0, window_bounds = array<i64: 8, 32>}, {transform_indices = @transform_1, window_bounds = array<i64: 1, 32>}, {transform_indices = @transform_2, window_bounds = array<i64: 1, 32>}, {transform_indices = @transform_3, window_bounds = array<i64: 1, 32>}, {transform_indices = @transform_4, window_bounds = array<i64: 1, 32>}, {transform_indices = @transform_5, window_bounds = array<i64: 8, 32>}, {transform_indices = @transform_6, window_bounds = array<i64: 1, 32>}, {transform_indices = @transform_7, window_bounds = array<i64: 1, 32>}]} {
    %c0 = arith.constant 0 : index
    %c0_0 = arith.constant 0 : index
    %0 = vector.load %arg1[%c0, %c0_0] : memref<8x32xf32, #tpu.memory_space<vmem>>, vector<8x32xf32>
    %cst = arith.constant dense<0.000000e+00> : vector<32xf32>
    %1 = vector.multi_reduction <add>, %0, %cst [0] : vector<8x32xf32> to vector<32xf32>
    %2 = vector.shape_cast %1 : vector<32xf32> to vector<1x32xf32>
    %cst_1 = arith.constant 1.250000e-01 : f32
    %3 = vector.broadcast %cst_1 : f32 to vector<1x32xf32>
    %4 = arith.mulf %2, %3 : vector<1x32xf32>
    %c0_2 = arith.constant 0 : index
    %c0_3 = arith.constant 0 : index
    %5 = vector.load %arg1[%c0_2, %c0_3] : memref<8x32xf32, #tpu.memory_space<vmem>>, vector<8x32xf32>
    %6 = vector.broadcast %4 : vector<1x32xf32> to vector<8x32xf32>
    %7 = arith.subf %5, %6 : vector<8x32xf32>
    %8 = arith.mulf %7, %7 : vector<8x32xf32>
    %cst_4 = arith.constant dense<0.000000e+00> : vector<32xf32>
    %9 = vector.multi_reduction <add>, %8, %cst_4 [0] : vector<8x32xf32> to vector<32xf32>
    %10 = vector.shape_cast %9 : vector<32xf32> to vector<1x32xf32>
    %cst_5 = arith.constant 1.250000e-01 : f32
    %11 = vector.broadcast %cst_5 : f32 to vector<1x32xf32>
    %12 = arith.mulf %10, %11 : vector<1x32xf32>
    %cst_6 = arith.constant 9.99999997E-7 : f32
    %13 = vector.broadcast %cst_6 : f32 to vector<1x32xf32>
    %14 = arith.addf %12, %13 : vector<1x32xf32>
    %15 = math.rsqrt %14 : vector<1x32xf32>
    %c0_7 = arith.constant 0 : index
    %c0_8 = arith.constant 0 : index
    %16 = vector.load %arg2[%c0_7, %c0_8] : memref<1x32xf32, #tpu.memory_space<vmem>>, vector<1x32xf32>
    %17 = arith.mulf %16, %15 : vector<1x32xf32>
    %c0_9 = arith.constant 0 : index
    %c0_10 = arith.constant 0 : index
    %18 = vector.load %arg3[%c0_9, %c0_10] : memref<1x32xf32, #tpu.memory_space<vmem>>, vector<1x32xf32>
    %19 = arith.mulf %4, %17 : vector<1x32xf32>
    %20 = arith.subf %18, %19 : vector<1x32xf32>
    %c0_11 = arith.constant 0 : index
    %c0_12 = arith.constant 0 : index
    %21 = vector.load %arg1[%c0_11, %c0_12] : memref<8x32xf32, #tpu.memory_space<vmem>>, vector<8x32xf32>
    %22 = vector.broadcast %17 : vector<1x32xf32> to vector<8x32xf32>
    %23 = arith.mulf %21, %22 : vector<8x32xf32>
    %24 = vector.broadcast %20 : vector<1x32xf32> to vector<8x32xf32>
    %25 = arith.addf %23, %24 : vector<8x32xf32>
    %c0_13 = arith.constant 0 : index
    %c0_14 = arith.constant 0 : index
    %26 = vector.load %arg6[%c0_13, %c0_14] : memref<8x32xf32, #tpu.memory_space<vmem>>, vector<8x32xf32>
    tpu.vector_store %arg6[%c0_13, %c0_14], %25 {strides = array<i32>} : memref<8x32xf32, #tpu.memory_space<vmem>>, vector<8x32xf32>,
    %c0_15 = arith.constant 0 : index
    %c0_16 = arith.constant 0 : index
    %27 = vector.load %arg4[%c0_15, %c0_16] : memref<1x32xf32, #tpu.memory_space<vmem>>, vector<1x32xf32>
    %cst_17 = arith.constant 5.000000e-01 : f32
    %28 = vector.broadcast %cst_17 : f32 to vector<1x32xf32>
    %29 = arith.mulf %28, %27 : vector<1x32xf32>
    %cst_18 = arith.constant 5.000000e-01 : f32
    %30 = vector.broadcast %cst_18 : f32 to vector<1x32xf32>
    %31 = arith.mulf %30, %4 : vector<1x32xf32>
    %32 = arith.addf %29, %31 : vector<1x32xf32>
    %c0_19 = arith.constant 0 : index
    %c0_20 = arith.constant 0 : index
    %33 = vector.load %arg7[%c0_19, %c0_20] : memref<1x32xf32, #tpu.memory_space<vmem>>, vector<1x32xf32>
    tpu.vector_store %arg7[%c0_19, %c0_20], %32 {strides = array<i32>} : memref<1x32xf32, #tpu.memory_space<vmem>>, vector<1x32xf32>,
    %c0_21 = arith.constant 0 : index
    %c0_22 = arith.constant 0 : index
    %34 = vector.load %arg5[%c0_21, %c0_22] : memref<1x32xf32, #tpu.memory_space<vmem>>, vector<1x32xf32>
    %cst_23 = arith.constant 5.000000e-01 : f32
    %35 = vector.broadcast %cst_23 : f32 to vector<1x32xf32>
    %36 = arith.mulf %35, %34 : vector<1x32xf32>
    %cst_24 = arith.constant 5.000000e-01 : f32
    %37 = vector.broadcast %cst_24 : f32 to vector<1x32xf32>
    %38 = arith.mulf %37, %12 : vector<1x32xf32>
    %39 = arith.addf %36, %38 : vector<1x32xf32>
    %c0_25 = arith.constant 0 : index
    %c0_26 = arith.constant 0 : index
    %40 = vector.load %arg8[%c0_25, %c0_26] : memref<1x32xf32, #tpu.memory_space<vmem>>, vector<1x32xf32>
    tpu.vector_store %arg8[%c0_25, %c0_26], %39 {strides = array<i32>} : memref<1x32xf32, #tpu.memory_space<vmem>>, vector<1x32xf32>,
    return
  }
  func.func @transform_0(%arg0: i32) -> (i32, i32) {
    %c0_i32 = arith.constant 0 : i32
    %c0_i32_0 = arith.constant 0 : i32
    return %c0_i32, %arg0 : i32, i32
  }
  func.func @transform_1(%arg0: i32) -> (i32, i32) {
    %c0_i32 = arith.constant 0 : i32
    %c0_i32_0 = arith.constant 0 : i32
    return %c0_i32, %arg0 : i32, i32
  }
  func.func @transform_2(%arg0: i32) -> (i32, i32) {
    %c0_i32 = arith.constant 0 : i32
    %c0_i32_0 = arith.constant 0 : i32
    return %c0_i32, %arg0 : i32, i32
  }
  func.func @transform_3(%arg0: i32) -> (i32, i32) {
    %c0_i32 = arith.constant 0 : i32
    %c0_i32_0 = arith.constant 0 : i32
    return %c0_i32, %arg0 : i32, i32
  }
  func.func @transform_4(%arg0: i32) -> (i32, i32) {
    %c0_i32 = arith.constant 0 : i32
    %c0_i32_0 = arith.constant 0 : i32
    return %c0_i32, %arg0 : i32, i32
  }
  func.func @transform_5(%arg0: i32) -> (i32, i32) {
    %c0_i32 = arith.constant 0 : i32
    %c0_i32_0 = arith.constant 0 : i32
    return %c0_i32, %arg0 : i32, i32
  }
  func.func @transform_6(%arg0: i32) -> (i32, i32) {
    %c0_i32 = arith.constant 0 : i32
    %c0_i32_0 = arith.constant 0 : i32
    return %c0_i32, %arg0 : i32, i32
  }
  func.func @transform_7(%arg0: i32) -> (i32, i32) {
    %c0_i32 = arith.constant 0 : i32
    %c0_i32_0 = arith.constant 0 : i32
    return %c0_i32, %arg0 : i32, i32
  }
}

</mosaic_0001>

<bundles_post_ra>
// kernel: mybn_forward.1
= control target key start
LH: loop header
LB: loop body
LE: loop exit
PB: predicated region body
PF: predicated region fallthrough
CT: control target
= control target key end

     0   :  { %13 = vsyncpa [#allocation3], 0  ;;  %s324_s0 = inlined_call_operand.hbm [shape: f32[8,32], index: 0, kind: input, shape index: {}]   ;;  %s325_s1 = inlined_call_operand.vmem [shape: f32[1,32], index: 1, kind: input, shape index: {}]   ;;  %s326_s2 = inlined_call_operand.vmem [shape: f32[1,32], index: 2, kind: input, shape index: {}]   ;;  %s327_s3 = inlined_call_operand.vmem [shape: f32[1,32], index: 3, kind: input, shape index: {}]   ;;  %s328_s4 = inlined_call_operand.vmem [shape: f32[1,32], index: 4, kind: input, shape index: {}]   ;;  %s329_s5 = inlined_call_operand.hbm [shape: f32[8,32], index: 5, kind: output, shape index: {0}]   ;;  %s330_s6 = inlined_call_operand.hbm [shape: f32[1,32], index: 6, kind: output, shape index: {1}]   ;;  %s331_s7 = inlined_call_operand.hbm [shape: f32[1,32], index: 7, kind: output, shape index: {2}]  }
   0x1   :  { %14 = vsyncpa [#allocation4], 0 }
   0x2   :  { %15 = vsyncpa [#allocation7], 0  ;;  %s21_s26 = sshll.u32 %s324_s0, 4  ;;  %s251_s27 = smov [#allocation2]   ;;  %s22_s26 = int_to_ptr.hbm [resolvable:$true] %s21_s26 }
   0x3   :  { %s23_s28 = sshll.u32 %s251_s27, 4  ;;  %s24_s28 = int_to_ptr.vmem [resolvable:$true] %s23_s28 }
   0x4   :  { %26 = dma.hbm_to_vmem [thread:$0]  %s22_s26, 128, %s24_s28, [#allocation3]  }
   0x5   :  { %245 = dma.done.wait [#allocation3], 128  }
   0x6   :  { %246 = vsyncadd [#allocation3], 4294967168  ;;  %vm40_vm0 = vcmask 261120   ;;  %v39_v0 = vld [vmem:[#allocation2] sm:$0xff]  ;;  %s252_s0 = smov [#allocation6]   ;;  %s113_s11 = sshll.u32 %s330_s6, 4  ;;  %s114_s11 = int_to_ptr.hbm [resolvable:$true] %s113_s11 }
   0x7   :  { %v41_v1 = vsel %vm40_vm0, %v39_v0, 0.0  ;;  %v84_v7 = vld [vmem:[%s327_s3] sm:$0x1]  ;;  %s111_s8 = sshll.u32 %s252_s0, 4  ;;  %vm88_vm1 = vcmask 253952   ;;  %s253_s6 = smov [#allocation8]   ;;  %s112_s8 = int_to_ptr.vmem [resolvable:$true] %s111_s8 }
   0x8   :  { %v42_v2 = vrot.slane %v41_v1, 4  ;;  %v85_v10 = vmul.f32 0.5, %v84_v7  ;;  %v90_v21 = vld [vmem:[%s328_s4] sm:$0x1]  ;;  %s122_s13 = sshll.u32 %s253_s6, 4  ;;  %s124_s16 = sshll.u32 %s331_s7, 4  ;;  %s123_s13 = int_to_ptr.vmem [resolvable:$true] %s122_s13  ;;  %s125_s16 = int_to_ptr.hbm [resolvable:$true] %s124_s16 }
   0x9   :  { %v91_v24 = vmul.f32 0.5, %v90_v21  ;;  %v70_v34 = vld [vmem:[%s325_s1] sm:$0x1]  ;;  %s254_s19 = smov [#allocation5]   ;;  %s102_s23 = sshll.u32 %s329_s5, 4  ;;  %s103_s23 = int_to_ptr.hbm [resolvable:$true] %s102_s23 }
   0xa   :  { %v43_v3 = vadd.f32 %v42_v2, %v41_v1  ;;  %v72_v37 = vld [vmem:[%s326_s2] sm:$0x1]  ;;  %s100_s20 = sshll.u32 %s254_s19, 4  ;;  %s101_s20 = int_to_ptr.vmem [resolvable:$true] %s100_s20 }
   0xc   :  { %v44_v4 = vrot.slane %v43_v3, 2 }
   0xe   :  { %v45_v5 = vadd.f32 %v44_v4, %v43_v3 }
  0x10   :  { %v46_v6 = vrot.slane %v45_v5, 1 }
  0x12   :  { %v47_v8 = vadd.f32 %v46_v6, %v45_v5 }
  0x14   :  { %v48_v9 = vmul.f32 0.125, %v47_v8 }
  0x16   :  { %v49_v11 = vsub.f32 %v39_v0, %v48_v9  ;;  %v86_v12 = vmul.f32 0.5, %v48_v9 }
  0x18   :  { %v50_v13 = vmul.f32 %v49_v11, %v49_v11  ;;  %v87_v14 = vadd.f32 %v86_v12, %v85_v10 }
  0x1a   :  { %v51_v15 = vsel %vm40_vm0, %v50_v13, 0.0  ;;  %89 = vst.msk [vmem:[#allocation6] sm:$0x1] %vm88_vm1, %v87_v14 }
  0x1b   :  { %v52_v16 = vrot.slane %v51_v15, 4  ;;  %116 = dma.vmem_to_hbm [thread:$0]  %s112_s8, 16, %s114_s11, [#allocation7]  }
  0x1d   :  { %v53_v17 = vadd.f32 %v52_v16, %v51_v15 }
  0x1f   :  { %v54_v18 = vrot.slane %v53_v17, 2 }
  0x21   :  { %v55_v19 = vadd.f32 %v54_v18, %v53_v17 }
  0x23   :  { %v56_v20 = vrot.slane %v55_v19, 1 }
  0x25   :  { %v57_v22 = vadd.f32 %v56_v20, %v55_v19 }
  0x27   :  { %v58_v23 = vmul.f32 0.125, %v57_v22 }
  0x29   :  { %v59_v25 = vadd.f32 1e-06, %v58_v23  ;;  %v92_v26 = vmul.f32 0.5, %v58_v23 }
  0x2b   :  { %147 = vrsqrt.f32 %v59_v25  ;;  %v93_v27 = vadd.f32 %v92_v26, %v91_v24  ;;  %vm66_vm2 = vweird.f32 %v59_v25 }
  0x2d   :  { %94 = vst.msk [vmem:[#allocation8] sm:$0x1] %vm88_vm1, %v93_v27 }
  0x2e   :  { %127 = dma.vmem_to_hbm [thread:$0]  %s123_s13, 16, %s125_s16, [#allocation7]  }
  0x31   :  { %v148_v28 = vpop.eup %147 }
  0x32   :  { %v61_v29 = vmul.f32 %v148_v28, %v59_v25  ;;  %vm67_vm3 = vweird.f32 %v148_v28 }
  0x33   :  { %vm68_vm4 = vmor %vm66_vm2, %vm67_vm3 }
  0x34   :  { %v62_v30 = vmul.f32 %v148_v28, %v61_v29 }
  0x36   :  { %v63_v31 = vmul.f32 0.5, %v62_v30 }
  0x38   :  { %v64_v32 = vsub.f32 1.5, %v63_v31 }
  0x3a   :  { %v65_v33 = vmul.f32 %v148_v28, %v64_v32 }
  0x3c   :  { %v69_v35 = vsel %vm68_vm4, %v148_v28, %v65_v33 }
  0x3d   :  { %v71_v36 = vmul.f32 %v70_v34, %v69_v35 }
  0x3f   :  { %v73_v38 = vmul.f32 %v71_v36, %v48_v9  ;;  %v76_v39 = vperm.slane %v71_v36, 0 }
  0x41   :  { %v74_v40 = vsub.f32 %v72_v37, %v73_v38  ;;  %v78_v41 = vmul.f32 %v76_v39, %v39_v0 }
  0x43   :  { %v80_v42 = vperm.slane %v74_v40, 0 }
  0x45   :  { %v82_v43 = vadd.f32 %v80_v42, %v78_v41 }
  0x47   :  { %83 = vst.msk [vmem:[#allocation5] sm:$0xff] %vm40_vm0, %v82_v43 }
  0x48   :  { %105 = dma.vmem_to_hbm [thread:$0]  %s101_s20, 128, %s103_s23, [#allocation4]  }
  0x49   :  { %247 = dma.done.wait [#allocation4], 128  }
  0x4a   :  { %248 = vsyncadd [#allocation4], 4294967168 }
  0x4b   :  { %249 = dma.done.wait [#allocation7], 32  }
  0x4c   :  { %250 = vsyncadd [#allocation7], 4294967264 }
  0x4d   :  { %140 = vsyncpa [#allocation3], 1 }
  0x4e   :  { %141 = vsyncpa [#allocation4], 1 }
  0x4f   :  { %142 = vsyncpa [#allocation7], 1 }

</bundles_post_ra>
